<compile_context>
chip_gen: v6e
topology: v6e:2x2x1
jax: 0.10.0
libtpu: 0.0.40
codegen_flags: <defaults>
</compile_context>

<pallas_src>
import functools

import jax
import jax.numpy as jnp
from jax import lax
from jax.experimental import pallas as pl
from jax.experimental.pallas import tpu as pltpu


def _policy_kernel(params_ref, x_ref, o_ref):
    """params_ref: SMEM flat (act_dim*(feat_dim+3),):
                   per action [w_0..w_{feat_dim-1}, bias, (hi-lo)/2, (hi+lo)/2].
    x_ref: VMEM (obs_dim, rows_tile, 128)  -- batch on (sublane, lane) axes.
    o_ref: VMEM (act_dim, rows_tile, 128)  -- lane/sublane-dense output.
    """
    obs_dim, rows, _ = x_ref.shape
    act_dim = o_ref.shape[0]
    feat_dim = obs_dim * (obs_dim + 1) // 2
    stride = feat_dim + 3

    # Hoist every scalar constant (SMEM read) out of the chunk loop.
    w = [[params_ref[k * stride + m] for m in range(feat_dim)]
         for k in range(act_dim)]
    bias = [params_ref[k * stride + feat_dim] for k in range(act_dim)]
    scale = [params_ref[k * stride + feat_dim + 1] for k in range(act_dim)]
    shift = [params_ref[k * stride + feat_dim + 2] for k in range(act_dim)]

    CH = 8                      # one (8,128) vreg of batch per chunk
    n_chunks = rows // CH       # rows_tile is always a multiple of 8

    def chunk(c, carry):
        r0 = pl.multiple_of(c * CH, CH)
        xs = [x_ref[i, pl.ds(r0, CH), :] for i in range(obs_dim)]
        for k in range(act_dim):
            # Factored degree-2 polynomial (same weight ordering as
            # make_features): z = sum_i x_i * (sum_{j>=i} w_ij * x_j) + b.
            idx = 0
            z = None
            for i in range(obs_dim):
                inner = xs[i] * w[k][idx]
                idx += 1
                for j in range(i + 1, obs_dim):
                    inner = inner + xs[j] * w[k][idx]
                    idx += 1
                term = xs[i] * inner
                z = term if z is None else z + term
            z = z + bias[k]
            o_ref[k, pl.ds(r0, CH), :] = scale[k] * jnp.tanh(z) + shift[k]
        return carry

    lax.fori_loop(0, n_chunks, chunk, 0, unroll=min(8, n_chunks))


def pack_params(w, b, act_high, act_low):
    """One-time constant packing (parameter-init time, not per call).

    w: (act_dim, feat_dim) torch-layout Linear weight; b: (act_dim,).
    Returns flat (act_dim*(feat_dim+3),) f32:
      per action [weights..., bias, (hi-lo)/2, (hi+lo)/2].
    """
    w = jnp.asarray(w, jnp.float32)
    act_dim, _ = w.shape
    b = jnp.asarray(b, jnp.float32).reshape(act_dim, 1)
    hi = jnp.asarray(act_high, jnp.float32).reshape(act_dim, 1)
    lo = jnp.asarray(act_low, jnp.float32).reshape(act_dim, 1)
    return jnp.concatenate(
        [w, b, (hi - lo) * 0.5, (hi + lo) * 0.5], axis=1).reshape(-1)


def _forward_xla(x, packed_params, act_dim):
    """Fused pure-XLA path (used for small batches and as a reference)."""
    obs_dim = x.shape[1]
    feat_dim = obs_dim * (obs_dim + 1) // 2
    p = packed_params.reshape(act_dim, feat_dim + 3)
    w, b = p[:, :feat_dim], p[:, feat_dim]
    scale, shift = p[:, feat_dim + 1], p[:, feat_dim + 2]
    cols = []
    for i in range(obs_dim):
        for j in range(i, obs_dim):
            cols.append(x[:, i] * x[:, j])
    feat = jnp.stack(cols, axis=1)
    return scale * jnp.tanh(feat @ w.T + b) + shift


def _round_up(n, m):
    return ((n + m - 1) // m) * m


@functools.partial(jax.jit, static_argnames=("rows_tile",))
def determ_policy_forward_transposed(xT, packed_params, *, rows_tile=512):
    """Transposed-layout entry point (avoids wrapper transposes for producers
    that can supply/consume it).  xT: (obs_dim, B) f32 -> (act_dim, B) f32."""
    obs_dim, B = xT.shape
    feat_dim = obs_dim * (obs_dim + 1) // 2
    stride = feat_dim + 3
    act_dim = packed_params.shape[0] // stride
    assert packed_params.shape[0] == act_dim * stride
    # Degree-2 only; Linear(obs_dim*degree) matches obs_dim*(obs_dim+1)//2
    # features only for obs_dim == 3 (the module's matching configuration).

    lanes = 128
    rows_needed = -(-B // lanes)
    n_tiles = max(1, -(-rows_needed // rows_tile))
    if n_tiles == 1 and rows_needed >= 16:
        n_tiles = 2                         # keep both v7x TensorCores busy
    rt = max(8, _round_up(-(-rows_needed // n_tiles), 8))
    rows = rt * n_tiles
    b_pad = rows * lanes

    xT = jnp.asarray(xT, jnp.float32)
    x3 = jnp.pad(xT, ((0, 0), (0, b_pad - B))).reshape(obs_dim, rows, lanes)

    out3 = pl.pallas_call(
        _policy_kernel,
        out_shape=jax.ShapeDtypeStruct((act_dim, rows, lanes), jnp.float32),
        grid=(n_tiles,),
        in_specs=[
            pl.BlockSpec(memory_space=pltpu.MemorySpace.SMEM),        # constants
            pl.BlockSpec((obs_dim, rt, lanes), lambda g: (0, g, 0)),  # x tile
        ],
        out_specs=pl.BlockSpec((act_dim, rt, lanes), lambda g: (0, g, 0)),
        compiler_params=pltpu.CompilerParams(
            dimension_semantics=("parallel",)),
    )(packed_params, x3)

    return out3.reshape(act_dim, b_pad)[:, :B]


@functools.partial(jax.jit, static_argnames=("rows_tile", "min_pallas_batch"))
def determ_policy_forward(x, packed_params, *, rows_tile=512,
                          min_pallas_batch=2048):
    """x: (B, obs_dim) f32 -> action (B, act_dim), matching the torch module."""
    B, obs_dim = x.shape
    feat_dim = obs_dim * (obs_dim + 1) // 2
    act_dim = packed_params.shape[0] // (feat_dim + 3)
    x = jnp.asarray(x, jnp.float32)
    if B < min_pallas_batch:
        # pallas_call launch cost + layout plumbing dominates tiny batches.
        return _forward_xla(x, packed_params, act_dim)
    outT = determ_policy_forward_transposed(
        x.T, packed_params, rows_tile=rows_tile)
    return outT.T


def _reference_forward(x, w, b, act_high, act_low):
    obs_dim = x.shape[1]
    cols = []
    for i in range(obs_dim):
        for j in range(i, obs_dim):
            cols.append(x[:, i] * x[:, j])
    feat = jnp.stack(cols, axis=1)
    z = feat @ w.T + b
    return (act_high - act_low) / 2.0 * jnp.tanh(z) + (act_high + act_low) / 2.0


if __name__ == "__main__":
    # Module-implied config: obs_dim=3, degree=2 -> feat_dim = 6 = obs_dim*degree.
    obs_dim, act_dim = 3, 2
    feat_dim = obs_dim * (obs_dim + 1) // 2   # == 6

    key = jax.random.PRNGKey(0)
    kx1, kx2, kw, kb = jax.random.split(key, 4)

    # Deterministic synthetic Linear params (torch layout: (act_dim, in_features)).
    w = jax.random.normal(kw, (act_dim, feat_dim), dtype=jnp.float32) * 0.1
    b = jax.random.normal(kb, (act_dim,), dtype=jnp.float32) * 0.1
    act_high = jnp.array([1.0, 2.0], dtype=jnp.float32)
    act_low = jnp.array([-1.0, -0.5], dtype=jnp.float32)
    params = pack_params(w, b, act_high, act_low)

    # 1) Pallas path: batch big enough to amortize launch cost; not a multiple
    #    of 128 so padding / tiling is exercised.
    x_big = jax.random.normal(kx1, (4100, obs_dim), dtype=jnp.float32)
    out_big = jax.block_until_ready(determ_policy_forward(x_big, params))
    ref_big = _reference_forward(x_big, w, b, act_high, act_low)
    assert out_big.shape == (4100, act_dim)
    assert jnp.allclose(out_big, ref_big, atol=1e-5, rtol=1e-5)

    # 2) Small-batch path: fused XLA fallback.
    x_small = jax.random.normal(kx2, (8, obs_dim), dtype=jnp.float32)
    out_small = jax.block_until_ready(determ_policy_forward(x_small, params))
    ref_small = _reference_forward(x_small, w, b, act_high, act_low)
    assert out_small.shape == (8, act_dim)
    assert jnp.allclose(out_small, ref_small, atol=1e-5, rtol=1e-5)

    print("KERNEL_OK")
</pallas_src>

<mosaic_0001>
module attributes {stable_mosaic.version = 11 : i64} {
  func.func @_policy_kernel(%arg0: i32, %arg1: memref<18xf32, #tpu.memory_space<smem>>, %arg2: memref<3x24x128xf32, #tpu.memory_space<vmem>>, %arg3: memref<2x24x128xf32, #tpu.memory_space<vmem>>) attributes {dimension_semantics = [#tpu.dimension_semantics<parallel>], iteration_bounds = array<i64: 2>, scalar_prefetch = 0 : i64, scratch_operands = 0 : i64, tpu.core_type = #tpu.core_type<tc>, window_params = [{transform_indices = @transform_0, window_bounds = array<i64: 18>}, {transform_indices = @transform_1, window_bounds = array<i64: 3, 24, 128>}, {transform_indices = @transform_2, window_bounds = array<i64: 2, 24, 128>}]} {
    %c0 = arith.constant 0 : index
    %0 = memref.load %arg1[%c0] : memref<18xf32, #tpu.memory_space<smem>>
    %c1 = arith.constant 1 : index
    %1 = memref.load %arg1[%c1] : memref<18xf32, #tpu.memory_space<smem>>
    %c2 = arith.constant 2 : index
    %2 = memref.load %arg1[%c2] : memref<18xf32, #tpu.memory_space<smem>>
    %c3 = arith.constant 3 : index
    %3 = memref.load %arg1[%c3] : memref<18xf32, #tpu.memory_space<smem>>
    %c4 = arith.constant 4 : index
    %4 = memref.load %arg1[%c4] : memref<18xf32, #tpu.memory_space<smem>>
    %c5 = arith.constant 5 : index
    %5 = memref.load %arg1[%c5] : memref<18xf32, #tpu.memory_space<smem>>
    %c9 = arith.constant 9 : index
    %6 = memref.load %arg1[%c9] : memref<18xf32, #tpu.memory_space<smem>>
    %c10 = arith.constant 10 : index
    %7 = memref.load %arg1[%c10] : memref<18xf32, #tpu.memory_space<smem>>
    %c11 = arith.constant 11 : index
    %8 = memref.load %arg1[%c11] : memref<18xf32, #tpu.memory_space<smem>>
    %c12 = arith.constant 12 : index
    %9 = memref.load %arg1[%c12] : memref<18xf32, #tpu.memory_space<smem>>
    %c13 = arith.constant 13 : index
    %10 = memref.load %arg1[%c13] : memref<18xf32, #tpu.memory_space<smem>>
    %c14 = arith.constant 14 : index
    %11 = memref.load %arg1[%c14] : memref<18xf32, #tpu.memory_space<smem>>
    %c6 = arith.constant 6 : index
    %12 = memref.load %arg1[%c6] : memref<18xf32, #tpu.memory_space<smem>>
    %c15 = arith.constant 15 : index
    %13 = memref.load %arg1[%c15] : memref<18xf32, #tpu.memory_space<smem>>
    %c7 = arith.constant 7 : index
    %14 = memref.load %arg1[%c7] : memref<18xf32, #tpu.memory_space<smem>>
    %c16 = arith.constant 16 : index
    %15 = memref.load %arg1[%c16] : memref<18xf32, #tpu.memory_space<smem>>
    %c8 = arith.constant 8 : index
    %16 = memref.load %arg1[%c8] : memref<18xf32, #tpu.memory_space<smem>>
    %c17 = arith.constant 17 : index
    %17 = memref.load %arg1[%c17] : memref<18xf32, #tpu.memory_space<smem>>
    %c0_i32 = arith.constant 0 : i32
    %c8_i32 = arith.constant 8 : i32
    %18 = arith.muli %c0_i32, %c8_i32 : i32
    %19 = tpu.assume_multiple %18, 8 : i32
    %c0_0 = arith.constant 0 : index
    %20 = arith.index_cast %19 : i32 to index
    %c0_1 = arith.constant 0 : index
    %21 = vector.load %arg2[%c0_0, %20, %c0_1] : memref<3x24x128xf32, #tpu.memory_space<vmem>>, vector<1x8x128xf32>
    %22 = vector.shape_cast %21 : vector<1x8x128xf32> to vector<8x128xf32>
    %c1_2 = arith.constant 1 : index
    %23 = arith.index_cast %19 : i32 to index
    %c0_3 = arith.constant 0 : index
    %24 = vector.load %arg2[%c1_2, %23, %c0_3] : memref<3x24x128xf32, #tpu.memory_space<vmem>>, vector<1x8x128xf32>
    %25 = vector.shape_cast %24 : vector<1x8x128xf32> to vector<8x128xf32>
    %c2_4 = arith.constant 2 : index
    %26 = arith.index_cast %19 : i32 to index
    %c0_5 = arith.constant 0 : index
    %27 = vector.load %arg2[%c2_4, %26, %c0_5] : memref<3x24x128xf32, #tpu.memory_space<vmem>>, vector<1x8x128xf32>
    %28 = vector.shape_cast %27 : vector<1x8x128xf32> to vector<8x128xf32>
    %29 = vector.broadcast %0 : f32 to vector<8x128xf32>
    %30 = arith.mulf %22, %29 : vector<8x128xf32>
    %31 = vector.broadcast %1 : f32 to vector<8x128xf32>
    %32 = arith.mulf %25, %31 : vector<8x128xf32>
    %33 = arith.addf %30, %32 : vector<8x128xf32>
    %34 = vector.broadcast %2 : f32 to vector<8x128xf32>
    %35 = arith.mulf %28, %34 : vector<8x128xf32>
    %36 = arith.addf %33, %35 : vector<8x128xf32>
    %37 = arith.mulf %22, %36 : vector<8x128xf32>
    %38 = vector.broadcast %3 : f32 to vector<8x128xf32>
    %39 = arith.mulf %25, %38 : vector<8x128xf32>
    %40 = vector.broadcast %4 : f32 to vector<8x128xf32>
    %41 = arith.mulf %28, %40 : vector<8x128xf32>
    %42 = arith.addf %39, %41 : vector<8x128xf32>
    %43 = arith.mulf %25, %42 : vector<8x128xf32>
    %44 = arith.addf %37, %43 : vector<8x128xf32>
    %45 = vector.broadcast %5 : f32 to vector<8x128xf32>
    %46 = arith.mulf %28, %45 : vector<8x128xf32>
    %47 = arith.mulf %28, %46 : vector<8x128xf32>
    %48 = arith.addf %44, %47 : vector<8x128xf32>
    %49 = vector.broadcast %12 : f32 to vector<8x128xf32>
    %50 = arith.addf %48, %49 : vector<8x128xf32>
    %51 = math.tanh %50 : vector<8x128xf32>
    %52 = vector.broadcast %14 : f32 to vector<8x128xf32>
    %53 = arith.mulf %52, %51 : vector<8x128xf32>
    %54 = vector.broadcast %16 : f32 to vector<8x128xf32>
    %55 = arith.addf %53, %54 : vector<8x128xf32>
    %c0_6 = arith.constant 0 : index
    %56 = arith.index_cast %19 : i32 to index
    %c0_7 = arith.constant 0 : index
    %57 = vector.load %arg3[%c0_6, %56, %c0_7] : memref<2x24x128xf32, #tpu.memory_space<vmem>>, vector<1x8x128xf32>
    %58 = vector.shape_cast %57 : vector<1x8x128xf32> to vector<8x128xf32>
    %59 = vector.shape_cast %55 : vector<8x128xf32> to vector<1x8x128xf32>
    tpu.vector_store %arg3[%c0_6, %56, %c0_7], %59 {strides = array<i32>} : memref<2x24x128xf32, #tpu.memory_space<vmem>>, vector<1x8x128xf32>,
    %60 = vector.broadcast %6 : f32 to vector<8x128xf32>
    %61 = arith.mulf %22, %60 : vector<8x128xf32>
    %62 = vector.broadcast %7 : f32 to vector<8x128xf32>
    %63 = arith.mulf %25, %62 : vector<8x128xf32>
    %64 = arith.addf %61, %63 : vector<8x128xf32>
    %65 = vector.broadcast %8 : f32 to vector<8x128xf32>
    %66 = arith.mulf %28, %65 : vector<8x128xf32>
    %67 = arith.addf %64, %66 : vector<8x128xf32>
    %68 = arith.mulf %22, %67 : vector<8x128xf32>
    %69 = vector.broadcast %9 : f32 to vector<8x128xf32>
    %70 = arith.mulf %25, %69 : vector<8x128xf32>
    %71 = vector.broadcast %10 : f32 to vector<8x128xf32>
    %72 = arith.mulf %28, %71 : vector<8x128xf32>
    %73 = arith.addf %70, %72 : vector<8x128xf32>
    %74 = arith.mulf %25, %73 : vector<8x128xf32>
    %75 = arith.addf %68, %74 : vector<8x128xf32>
    %76 = vector.broadcast %11 : f32 to vector<8x128xf32>
    %77 = arith.mulf %28, %76 : vector<8x128xf32>
    %78 = arith.mulf %28, %77 : vector<8x128xf32>
    %79 = arith.addf %75, %78 : vector<8x128xf32>
    %80 = vector.broadcast %13 : f32 to vector<8x128xf32>
    %81 = arith.addf %79, %80 : vector<8x128xf32>
    %82 = math.tanh %81 : vector<8x128xf32>
    %83 = vector.broadcast %15 : f32 to vector<8x128xf32>
    %84 = arith.mulf %83, %82 : vector<8x128xf32>
    %85 = vector.broadcast %17 : f32 to vector<8x128xf32>
    %86 = arith.addf %84, %85 : vector<8x128xf32>
    %c1_8 = arith.constant 1 : index
    %87 = arith.index_cast %19 : i32 to index
    %c0_9 = arith.constant 0 : index
    %88 = vector.load %arg3[%c1_8, %87, %c0_9] : memref<2x24x128xf32, #tpu.memory_space<vmem>>, vector<1x8x128xf32>
    %89 = vector.shape_cast %88 : vector<1x8x128xf32> to vector<8x128xf32>
    %90 = vector.shape_cast %86 : vector<8x128xf32> to vector<1x8x128xf32>
    tpu.vector_store %arg3[%c1_8, %87, %c0_9], %90 {strides = array<i32>} : memref<2x24x128xf32, #tpu.memory_space<vmem>>, vector<1x8x128xf32>,
    %c1_i32 = arith.constant 1 : i32
    %c8_i32_10 = arith.constant 8 : i32
    %91 = arith.muli %c1_i32, %c8_i32_10 : i32
    %92 = tpu.assume_multiple %91, 8 : i32
    %c0_11 = arith.constant 0 : index
    %93 = arith.index_cast %92 : i32 to index
    %c0_12 = arith.constant 0 : index
    %94 = vector.load %arg2[%c0_11, %93, %c0_12] : memref<3x24x128xf32, #tpu.memory_space<vmem>>, vector<1x8x128xf32>
    %95 = vector.shape_cast %94 : vector<1x8x128xf32> to vector<8x128xf32>
    %c1_13 = arith.constant 1 : index
    %96 = arith.index_cast %92 : i32 to index
    %c0_14 = arith.constant 0 : index
    %97 = vector.load %arg2[%c1_13, %96, %c0_14] : memref<3x24x128xf32, #tpu.memory_space<vmem>>, vector<1x8x128xf32>
    %98 = vector.shape_cast %97 : vector<1x8x128xf32> to vector<8x128xf32>
    %c2_15 = arith.constant 2 : index
    %99 = arith.index_cast %92 : i32 to index
    %c0_16 = arith.constant 0 : index
    %100 = vector.load %arg2[%c2_15, %99, %c0_16] : memref<3x24x128xf32, #tpu.memory_space<vmem>>, vector<1x8x128xf32>
    %101 = vector.shape_cast %100 : vector<1x8x128xf32> to vector<8x128xf32>
    %102 = vector.broadcast %0 : f32 to vector<8x128xf32>
    %103 = arith.mulf %95, %102 : vector<8x128xf32>
    %104 = vector.broadcast %1 : f32 to vector<8x128xf32>
    %105 = arith.mulf %98, %104 : vector<8x128xf32>
    %106 = arith.addf %103, %105 : vector<8x128xf32>
    %107 = vector.broadcast %2 : f32 to vector<8x128xf32>
    %108 = arith.mulf %101, %107 : vector<8x128xf32>
    %109 = arith.addf %106, %108 : vector<8x128xf32>
    %110 = arith.mulf %95, %109 : vector<8x128xf32>
    %111 = vector.broadcast %3 : f32 to vector<8x128xf32>
    %112 = arith.mulf %98, %111 : vector<8x128xf32>
    %113 = vector.broadcast %4 : f32 to vector<8x128xf32>
    %114 = arith.mulf %101, %113 : vector<8x128xf32>
    %115 = arith.addf %112, %114 : vector<8x128xf32>
    %116 = arith.mulf %98, %115 : vector<8x128xf32>
    %117 = arith.addf %110, %116 : vector<8x128xf32>
    %118 = vector.broadcast %5 : f32 to vector<8x128xf32>
    %119 = arith.mulf %101, %118 : vector<8x128xf32>
    %120 = arith.mulf %101, %119 : vector<8x128xf32>
    %121 = arith.addf %117, %120 : vector<8x128xf32>
    %122 = vector.broadcast %12 : f32 to vector<8x128xf32>
    %123 = arith.addf %121, %122 : vector<8x128xf32>
    %124 = math.tanh %123 : vector<8x128xf32>
    %125 = vector.broadcast %14 : f32 to vector<8x128xf32>
    %126 = arith.mulf %125, %124 : vector<8x128xf32>
    %127 = vector.broadcast %16 : f32 to vector<8x128xf32>
    %128 = arith.addf %126, %127 : vector<8x128xf32>
    %c0_17 = arith.constant 0 : index
    %129 = arith.index_cast %92 : i32 to index
    %c0_18 = arith.constant 0 : index
    %130 = vector.load %arg3[%c0_17, %129, %c0_18] : memref<2x24x128xf32, #tpu.memory_space<vmem>>, vector<1x8x128xf32>
    %131 = vector.shape_cast %130 : vector<1x8x128xf32> to vector<8x128xf32>
    %132 = vector.shape_cast %128 : vector<8x128xf32> to vector<1x8x128xf32>
    tpu.vector_store %arg3[%c0_17, %129, %c0_18], %132 {strides = array<i32>} : memref<2x24x128xf32, #tpu.memory_space<vmem>>, vector<1x8x128xf32>,
    %133 = vector.broadcast %6 : f32 to vector<8x128xf32>
    %134 = arith.mulf %95, %133 : vector<8x128xf32>
    %135 = vector.broadcast %7 : f32 to vector<8x128xf32>
    %136 = arith.mulf %98, %135 : vector<8x128xf32>
    %137 = arith.addf %134, %136 : vector<8x128xf32>
    %138 = vector.broadcast %8 : f32 to vector<8x128xf32>
    %139 = arith.mulf %101, %138 : vector<8x128xf32>
    %140 = arith.addf %137, %139 : vector<8x128xf32>
    %141 = arith.mulf %95, %140 : vector<8x128xf32>
    %142 = vector.broadcast %9 : f32 to vector<8x128xf32>
    %143 = arith.mulf %98, %142 : vector<8x128xf32>
    %144 = vector.broadcast %10 : f32 to vector<8x128xf32>
    %145 = arith.mulf %101, %144 : vector<8x128xf32>
    %146 = arith.addf %143, %145 : vector<8x128xf32>
    %147 = arith.mulf %98, %146 : vector<8x128xf32>
    %148 = arith.addf %141, %147 : vector<8x128xf32>
    %149 = vector.broadcast %11 : f32 to vector<8x128xf32>
    %150 = arith.mulf %101, %149 : vector<8x128xf32>
    %151 = arith.mulf %101, %150 : vector<8x128xf32>
    %152 = arith.addf %148, %151 : vector<8x128xf32>
    %153 = vector.broadcast %13 : f32 to vector<8x128xf32>
    %154 = arith.addf %152, %153 : vector<8x128xf32>
    %155 = math.tanh %154 : vector<8x128xf32>
    %156 = vector.broadcast %15 : f32 to vector<8x128xf32>
    %157 = arith.mulf %156, %155 : vector<8x128xf32>
    %158 = vector.broadcast %17 : f32 to vector<8x128xf32>
    %159 = arith.addf %157, %158 : vector<8x128xf32>
    %c1_19 = arith.constant 1 : index
    %160 = arith.index_cast %92 : i32 to index
    %c0_20 = arith.constant 0 : index
    %161 = vector.load %arg3[%c1_19, %160, %c0_20] : memref<2x24x128xf32, #tpu.memory_space<vmem>>, vector<1x8x128xf32>
    %162 = vector.shape_cast %161 : vector<1x8x128xf32> to vector<8x128xf32>
    %163 = vector.shape_cast %159 : vector<8x128xf32> to vector<1x8x128xf32>
    tpu.vector_store %arg3[%c1_19, %160, %c0_20], %163 {strides = array<i32>} : memref<2x24x128xf32, #tpu.memory_space<vmem>>, vector<1x8x128xf32>,
    %c2_i32 = arith.constant 2 : i32
    %c8_i32_21 = arith.constant 8 : i32
    %164 = arith.muli %c2_i32, %c8_i32_21 : i32
    %165 = tpu.assume_multiple %164, 8 : i32
    %c0_22 = arith.constant 0 : index
    %166 = arith.index_cast %165 : i32 to index
    %c0_23 = arith.constant 0 : index
    %167 = vector.load %arg2[%c0_22, %166, %c0_23] : memref<3x24x128xf32, #tpu.memory_space<vmem>>, vector<1x8x128xf32>
    %168 = vector.shape_cast %167 : vector<1x8x128xf32> to vector<8x128xf32>
    %c1_24 = arith.constant 1 : index
    %169 = arith.index_cast %165 : i32 to index
    %c0_25 = arith.constant 0 : index
    %170 = vector.load %arg2[%c1_24, %169, %c0_25] : memref<3x24x128xf32, #tpu.memory_space<vmem>>, vector<1x8x128xf32>
    %171 = vector.shape_cast %170 : vector<1x8x128xf32> to vector<8x128xf32>
    %c2_26 = arith.constant 2 : index
    %172 = arith.index_cast %165 : i32 to index
    %c0_27 = arith.constant 0 : index
    %173 = vector.load %arg2[%c2_26, %172, %c0_27] : memref<3x24x128xf32, #tpu.memory_space<vmem>>, vector<1x8x128xf32>
    %174 = vector.shape_cast %173 : vector<1x8x128xf32> to vector<8x128xf32>
    %175 = vector.broadcast %0 : f32 to vector<8x128xf32>
    %176 = arith.mulf %168, %175 : vector<8x128xf32>
    %177 = vector.broadcast %1 : f32 to vector<8x128xf32>
    %178 = arith.mulf %171, %177 : vector<8x128xf32>
    %179 = arith.addf %176, %178 : vector<8x128xf32>
    %180 = vector.broadcast %2 : f32 to vector<8x128xf32>
    %181 = arith.mulf %174, %180 : vector<8x128xf32>
    %182 = arith.addf %179, %181 : vector<8x128xf32>
    %183 = arith.mulf %168, %182 : vector<8x128xf32>
    %184 = vector.broadcast %3 : f32 to vector<8x128xf32>
    %185 = arith.mulf %171, %184 : vector<8x128xf32>
    %186 = vector.broadcast %4 : f32 to vector<8x128xf32>
    %187 = arith.mulf %174, %186 : vector<8x128xf32>
    %188 = arith.addf %185, %187 : vector<8x128xf32>
    %189 = arith.mulf %171, %188 : vector<8x128xf32>
    %190 = arith.addf %183, %189 : vector<8x128xf32>
    %191 = vector.broadcast %5 : f32 to vector<8x128xf32>
    %192 = arith.mulf %174, %191 : vector<8x128xf32>
    %193 = arith.mulf %174, %192 : vector<8x128xf32>
    %194 = arith.addf %190, %193 : vector<8x128xf32>
    %195 = vector.broadcast %12 : f32 to vector<8x128xf32>
    %196 = arith.addf %194, %195 : vector<8x128xf32>
    %197 = math.tanh %196 : vector<8x128xf32>
    %198 = vector.broadcast %14 : f32 to vector<8x128xf32>
    %199 = arith.mulf %198, %197 : vector<8x128xf32>
    %200 = vector.broadcast %16 : f32 to vector<8x128xf32>
    %201 = arith.addf %199, %200 : vector<8x128xf32>
    %c0_28 = arith.constant 0 : index
    %202 = arith.index_cast %165 : i32 to index
    %c0_29 = arith.constant 0 : index
    %203 = vector.load %arg3[%c0_28, %202, %c0_29] : memref<2x24x128xf32, #tpu.memory_space<vmem>>, vector<1x8x128xf32>
    %204 = vector.shape_cast %203 : vector<1x8x128xf32> to vector<8x128xf32>
    %205 = vector.shape_cast %201 : vector<8x128xf32> to vector<1x8x128xf32>
    tpu.vector_store %arg3[%c0_28, %202, %c0_29], %205 {strides = array<i32>} : memref<2x24x128xf32, #tpu.memory_space<vmem>>, vector<1x8x128xf32>,
    %206 = vector.broadcast %6 : f32 to vector<8x128xf32>
    %207 = arith.mulf %168, %206 : vector<8x128xf32>
    %208 = vector.broadcast %7 : f32 to vector<8x128xf32>
    %209 = arith.mulf %171, %208 : vector<8x128xf32>
    %210 = arith.addf %207, %209 : vector<8x128xf32>
    %211 = vector.broadcast %8 : f32 to vector<8x128xf32>
    %212 = arith.mulf %174, %211 : vector<8x128xf32>
    %213 = arith.addf %210, %212 : vector<8x128xf32>
    %214 = arith.mulf %168, %213 : vector<8x128xf32>
    %215 = vector.broadcast %9 : f32 to vector<8x128xf32>
    %216 = arith.mulf %171, %215 : vector<8x128xf32>
    %217 = vector.broadcast %10 : f32 to vector<8x128xf32>
    %218 = arith.mulf %174, %217 : vector<8x128xf32>
    %219 = arith.addf %216, %218 : vector<8x128xf32>
    %220 = arith.mulf %171, %219 : vector<8x128xf32>
    %221 = arith.addf %214, %220 : vector<8x128xf32>
    %222 = vector.broadcast %11 : f32 to vector<8x128xf32>
    %223 = arith.mulf %174, %222 : vector<8x128xf32>
    %224 = arith.mulf %174, %223 : vector<8x128xf32>
    %225 = arith.addf %221, %224 : vector<8x128xf32>
    %226 = vector.broadcast %13 : f32 to vector<8x128xf32>
    %227 = arith.addf %225, %226 : vector<8x128xf32>
    %228 = math.tanh %227 : vector<8x128xf32>
    %229 = vector.broadcast %15 : f32 to vector<8x128xf32>
    %230 = arith.mulf %229, %228 : vector<8x128xf32>
    %231 = vector.broadcast %17 : f32 to vector<8x128xf32>
    %232 = arith.addf %230, %231 : vector<8x128xf32>
    %c1_30 = arith.constant 1 : index
    %233 = arith.index_cast %165 : i32 to index
    %c0_31 = arith.constant 0 : index
    %234 = vector.load %arg3[%c1_30, %233, %c0_31] : memref<2x24x128xf32, #tpu.memory_space<vmem>>, vector<1x8x128xf32>
    %235 = vector.shape_cast %234 : vector<1x8x128xf32> to vector<8x128xf32>
    %236 = vector.shape_cast %232 : vector<8x128xf32> to vector<1x8x128xf32>
    tpu.vector_store %arg3[%c1_30, %233, %c0_31], %236 {strides = array<i32>} : memref<2x24x128xf32, #tpu.memory_space<vmem>>, vector<1x8x128xf32>,
    %c3_i32 = arith.constant 3 : i32
    return
  }
  func.func @transform_0(%arg0: i32) -> i32 {
    %c0_i32 = arith.constant 0 : i32
    %c0_i32_0 = arith.constant 0 : i32
    return %c0_i32 : i32
  }
  func.func @transform_1(%arg0: i32) -> (i32, i32, i32) {
    %c0_i32 = arith.constant 0 : i32
    %c0_i32_0 = arith.constant 0 : i32
    %c0_i32_1 = arith.constant 0 : i32
    return %c0_i32, %arg0, %c0_i32_0 : i32, i32, i32
  }
  func.func @transform_2(%arg0: i32) -> (i32, i32, i32) {
    %c0_i32 = arith.constant 0 : i32
    %c0_i32_0 = arith.constant 0 : i32
    %c0_i32_1 = arith.constant 0 : i32
    return %c0_i32, %arg0, %c0_i32_0 : i32, i32, i32
  }
}

</mosaic_0001>

<bundles_post_ra>
// kernel: determ_policy_forward_transposed.1
= control target key start
LH: loop header
LB: loop body
LE: loop exit
PB: predicated region body
PF: predicated region fallthrough
CT: control target
= control target key end

     0   :  { %7 = vsyncpa [#allocation3], 0  ;;  %s692_s9 = smov 0   ;;  %s694_s10 = smov 0   ;;  %s895_s0 = inlined_call_operand.vmem [shape: f32[18], index: 0, kind: input, shape index: {}]   ;;  %s896_s1 = inlined_call_operand.vmem [shape: f32[3,48,128], index: 1, kind: input, shape index: {}]   ;;  %s897_s2 = inlined_call_operand.vmem [shape: f32[2,48,128], index: 2, kind: output, shape index: {}]  }
   0x1   :  { %s696_s11 = smov 0  }
   0x2 LB: > { %s708_s12 = sadd.s32 4294967295, %s674_s11   ;;  %s711_s13 = sadd.s32 1, %s674_s11   ;;  %s674_s11 = sphi %s696_s11, %s904_s11   ;;  %s670_s10 = sphi %s694_s10, %s903_s10   ;;  %s666_s9 = sphi %s692_s9, %s902_s9  }
   0x3   : > { %s38_s14 = ssub.s32 %s674_s11, %s711_s13  ;;  %s41_s15 = sadd.s32 1, %s670_s10 }
   0x4   : > { %p39_p0 = scmp.eq.s32.totalorder %s38_s14, 0  ;;  %p48_p1 = scmp.ne.s32.totalorder %s670_s10, %s666_s9 }
   0x5   : > { %p49_p2 = scmp.eq.s32.totalorder %s674_s11, 0  ;;  %p78_p3 = scmp.eq.s32.totalorder %s708_s12, 1 }
   0x6   : > { %s721_s16 = scalar_select %p39_p0, %s670_s10, %s41_s15  }
   0x7   : > { %p723_p4 = por %p49_p2, %p48_p1  ;;  %p727_p5 = por %p78_p3, %p48_p1 }
   0x8   : > { %p542_p6 = scmp.ge.s32.totalorder %s674_s11, 1  ;;  %p91_p7 = scmp.lt.s32.totalorder %s674_s11, 3 }
   0x9   : > { %s899_s18 = scalar_select %p727_p5, 1, 0 }
   0xa   : > { %p594_p8 = scmp.eq.s32.totalorder %s708_s12, 0  ;;  %p734_p9 = pnand %p542_p6, %p91_p7 }
   0xb   : > { %s104_s22 = sshll.u32 %s895_s0, 4  ;;  %s105_s22 = int_to_ptr.vmem [resolvable:$true] %s104_s22 }
   0xc   : > { %p590_p10 = pneg %p734_p9  ;;  %s633_s23 = scalar_lea.vmem %s105_s22, 16 }
   0xd   : > { %p634_p12 = scmp.ne.s32.totalorder %s105_s22, %s633_s23  ;;  %p641_p2 = scmp.lt.s32.totalorder %s105_s22, %s105_s22 }
   0xe   : > { %p591_p11 = pnand %p594_p8, %p590_p10  ;;  %p642_p3 = scmp.lt.s32.totalorder %s633_s23, %s633_s23 }
  0x10   : > { %p635_p13 = pneg %p591_p11  ;;  %p643_p6 = por %p642_p3, %p641_p2 }
  0x12   : > { %p636_p0 = pnand %p635_p13, %p634_p12 }
  0x14   : > { %p637_p1 = pneg %p636_p0 }
  0x16   : > { %p644_p7 = pnand %p643_p6, %p637_p1 }
  0x18   : > { %647 = shalt.err (!%p644_p7)
}
  0x19   : > { %s676_s24 = smov [#allocation2]   ;;  %p544_p5 = scmp.ge.s32.totalorder %s674_s11, 2 }
  0x1a   : > { %593 = dma.vmem_to_smem (!%p591_p11), %s105_s22, 16, %s676_s24, [#allocation3]  }
  0x1b   : > { %111 = sbr.rel (%p544_p5) target bundleno = 42 (0x2a), region = 20 }
  0x20   : > { %114 = sbr.rel (!%p723_p4) target bundleno = 42 (0x2a), region = 24  ;;  %s116_s25 = sand.u32 (%p723_p4), 1, %s670_s10  }
  0x21   : > { %s581_s26 = smul.u32 (%p723_p4), 24, %s674_s11 }
  0x22   : > { %s583_s27 = smul.u32 (%p723_p4), 72, %s116_s25 }
  0x23   : > { %s121_s30 = scalar_lea.vmem (%p723_p4), %s896_s1, %s581_s26 }
  0x24   : > { %v166_v0 = vld [vmem:[%s121_s30] sm:$0xff] (%p723_p4)  ;;  %v168_v1 = vld [vmem:[%s121_s30 + $0x8] sm:$0xff] (%p723_p4)  ;;  %v170_v2 = vld [vmem:[%s121_s30 + $0x10] sm:$0xff] (%p723_p4)  ;;  %s118_s3 = scalar_lea.vmem (%p723_p4), [#allocation4], %s583_s27 }
  0x25   : > { %167 = vst [vmem:[%s118_s3] sm:$0xff] %v166_v0  ;;  %169 = vst [vmem:[%s118_s3 + $0x8] sm:$0xff] %v168_v1  ;;  %v172_v3 = vld [vmem:[%s121_s30 + $0x30] sm:$0xff]  ;;  %v174_v4 = vld [vmem:[%s121_s30 + $0x38] sm:$0xff] }
  0x26   : > { %171 = vst [vmem:[%s118_s3 + $0x10] sm:$0xff] %v170_v2  ;;  %v176_v5 = vld [vmem:[%s121_s30 + $0x40] sm:$0xff]  ;;  %173 = vst [vmem:[%s118_s3 + $0x18] sm:$0xff] %v172_v3  ;;  %v180_v7 = vld [vmem:[%s121_s30 + $0x68] sm:$0xff] }
  0x27   : > { %175 = vst [vmem:[%s118_s3 + $0x20] sm:$0xff] %v174_v4  ;;  %177 = vst [vmem:[%s118_s3 + $0x28] sm:$0xff] %v176_v5  ;;  %v178_v6 = vld [vmem:[%s121_s30 + $0x60] sm:$0xff]  ;;  %v182_v8 = vld [vmem:[%s121_s30 + $0x70] sm:$0xff] }
  0x28   : > { %179 = vst [vmem:[%s118_s3 + $0x30] sm:$0xff] %v178_v6  ;;  %181 = vst [vmem:[%s118_s3 + $0x38] sm:$0xff] %v180_v7 }
  0x29   : > { %183 = vst [vmem:[%s118_s3 + $0x40] sm:$0xff] %v182_v8 }
  0x2a PF: > { %192 = sbr.rel (%p734_p9) target bundleno = 120 (0x78), region = 62 }
  0x2f   : > { %661 = dma.done.wait (%p594_p8), [#allocation3], 16  }
  0x30   : > { %663 = vsyncadd (%p594_p8), [#allocation3], 4294967280  ;;  %s199_s4 = sand.u32 1, %s666_s9  }
  0x31   : > { %s584_s5 = smul.u32 72, %s199_s4 }
  0x33   : > { %s762_s6 = scalar_lea.vmem [#allocation4], %s584_s5 }
  0x34   : > { %205 = sfence }
  0x35   : > { %s222_s7 = sld [smem:[#allocation2]]  ;;  %v765_v9 = vld [vmem:[%s762_s6] sm:$0xff]  ;;  %v768_v10 = vld [vmem:[%s762_s6 + $0x8] sm:$0xff]  ;;  %v771_v11 = vld [vmem:[%s762_s6 + $0x18] sm:$0xff]  ;;  %s585_s29 = smul.u32 48, %s199_s4 }
  0x36   : > { %s548_s8 = sld [smem:[#allocation2 + $0x1]]  ;;  %v774_v12 = vld [vmem:[%s762_s6 + $0x20] sm:$0xff]  ;;  %v779_v13 = vld [vmem:[%s762_s6 + $0x30] sm:$0xff]  ;;  %v782_v15 = vld [vmem:[%s762_s6 + $0x38] sm:$0xff]  ;;  %p901_p4 = scmp.ne.s32.totalorder %s899_s18, 0 }
  0x37   : > { %s549_s11 = sld [smem:[#allocation2 + $0x2]]  ;;  %v795_v25 = vld [vmem:[%s762_s6 + $0x10] sm:$0xff]  ;;  %v802_v30 = vld [vmem:[%s762_s6 + $0x28] sm:$0xff]  ;;  %v813_v35 = vld [vmem:[%s762_s6 + $0x40] sm:$0xff]  ;;  %s219_s9 = scalar_lea.vmem [#allocation5], %s585_s29 }
  0x38   : > { %s550_s14 = sld [smem:[#allocation2 + $0x3]]  ;;  %s582_s4 = smul.u32 (%p901_p4), 24, %s708_s12 }
  0x39   : > { %s551_s15 = sld [smem:[#allocation2 + $0x4]] }
  0x3a   : > { %s552_s17 = sld [smem:[#allocation2 + $0x5]] }
  0x3b   : > { %s776_s19 = sld [smem:[#allocation2 + $0x6]]  ;;  %v247_v14 = vstv %s222_s7  ;;  %s409_s7 = scalar_lea.vmem (%p901_p4), %s897_s2, %s582_s4 }
  0x3c   : > { %v248_v16 = vmul.f32 %v247_v14, %v765_v9  ;;  %v249_v17 = vstv %s548_s8  ;;  %v312_v18 = vmul.f32 %v768_v10, %v247_v14  ;;  %s791_s20 = sld [smem:[#allocation2 + $0x9]]  ;;  %v360_v39 = vmul.f32 %v795_v25, %v247_v14 }
  0x3d   : > { %v250_v19 = vmul.f32 %v771_v11, %v249_v17  ;;  %v252_v20 = vstv %s549_s11  ;;  %v313_v21 = vmul.f32 %v774_v12, %v249_v17  ;;  %s554_s21 = sld [smem:[#allocation2 + $0xa]]  ;;  %v361_v43 = vmul.f32 %v802_v30, %v249_v17 }
  0x3e   : > { %v253_v22 = vmul.f32 %v779_v13, %v252_v20  ;;  %v789_v23 = vstv %s550_s14  ;;  %v315_v24 = vmul.f32 %v782_v15, %v252_v20  ;;  %s555_s22 = sld [smem:[#allocation2 + $0xb]]  ;;  %v363_v47 = vmul.f32 %v813_v35, %v252_v20 }
  0x3f   : > { %v251_v26 = vadd.f32 %v250_v19, %v248_v16  ;;  %v257_v27 = vmul.f32 %v771_v11, %v789_v23  ;;  %v799_v28 = vstv %s551_s15  ;;  %v314_v29 = vadd.f32 %v313_v21, %v312_v18  ;;  %s556_s23 = sld [smem:[#allocation2 + $0xc]] }
  0x40   : > { %v259_v31 = vmul.f32 %v779_v13, %v799_v28  ;;  %v806_v32 = vstv %s552_s17  ;;  %v318_v33 = vmul.f32 %v774_v12, %v789_v23  ;;  %v319_v34 = vmul.f32 %v782_v15, %v799_v28  ;;  %s557_s24 = sld [smem:[#allocation2 + $0xd]] }
  0x41   : > { %v254_v36 = vadd.f32 %v253_v22, %v251_v26  ;;  %v264_v37 = vmul.f32 %v779_v13, %v806_v32  ;;  %v316_v38 = vadd.f32 %v315_v24, %v314_v29  ;;  %v323_v42 = vmul.f32 %v782_v15, %v806_v32  ;;  %s558_s25 = sld [smem:[#allocation2 + $0xe]] }
  0x42   : > { %v260_v40 = vadd.f32 %v259_v31, %v257_v27  ;;  %v320_v41 = vadd.f32 %v319_v34, %v318_v33  ;;  %v823_v45 = vstv %s776_s19  ;;  %s829_s26 = sld [smem:[#allocation2 + $0xf]]  ;;  %v275_v50 = vstv %s791_s20 }
  0x43   : > { %v255_v44 = vmul.f32 %v254_v36, %v765_v9  ;;  %v317_v46 = vmul.f32 %v768_v10, %v316_v38  ;;  %v265_v49 = vmul.f32 %v779_v13, %v264_v37  ;;  %v276_v52 = vmul.f32 %v275_v50, %v765_v9  ;;  %s854_s27 = sld [smem:[#allocation2 + $0x7]] }
  0x44   : > { %v261_v48 = vmul.f32 %v771_v11, %v260_v40  ;;  %v321_v51 = vmul.f32 %v774_v12, %v320_v41  ;;  %v277_v53 = vstv %s554_s21  ;;  %v324_v54 = vmul.f32 %v782_v15, %v323_v42  ;;  %s563_s28 = sld [smem:[#allocation2 + $0x8]] }
  0x45   : > { %v332_v55 = vmul.f32 %v768_v10, %v275_v50  ;;  %v278_v57 = vmul.f32 %v771_v11, %v277_v53  ;;  %v280_v58 = vstv %s555_s22  ;;  %v284_v61 = vstv %s556_s23  ;;  %s562_s30 = sld [smem:[#allocation2 + $0x10]] }
  0x46   : > { %v262_v56 = vadd.f32 %v261_v48, %v255_v44  ;;  %v322_v59 = vadd.f32 %v321_v51, %v317_v46  ;;  %v281_v60 = vmul.f32 %v779_v13, %v280_v58  ;;  %v333_v62 = vmul.f32 %v774_v12, %v277_v53  ;;  %s564_s3 = sld [smem:[#allocation2 + $0x11]] }
  0x47   : > { %v335_v63 = vmul.f32 %v782_v15, %v280_v58  ;;  %v279_v1 = vadd.f32 %v278_v57, %v276_v52  ;;  %v285_v2 = vmul.f32 %v771_v11, %v284_v61  ;;  %v286_v3 = vstv %s557_s24 }
  0x48   : > { %v266_v0 = vadd.f32 %v265_v49, %v262_v56  ;;  %v287_v4 = vmul.f32 %v779_v13, %v286_v3  ;;  %v291_v5 = vstv %s558_s25  ;;  %v325_v6 = vadd.f32 %v324_v54, %v322_v59 }
  0x49   : > { %v334_v7 = vadd.f32 %v333_v62, %v332_v55  ;;  %v282_v14 = vadd.f32 %v281_v60, %v279_v1  ;;  %v292_v16 = vmul.f32 %v779_v13, %v291_v5  ;;  %v362_v17 = vadd.f32 %v361_v43, %v360_v39 }
  0x4a   : > { %v268_v8 = vadd.f32 %v823_v45, %v266_v0  ;;  %v288_v18 = vadd.f32 %v287_v4, %v285_v2  ;;  %v326_v19 = vadd.f32 %v325_v6, %v823_v45  ;;  %v295_v21 = vstv %s829_s26 }
  0x4b   : > { %v283_v20 = vmul.f32 %v282_v14, %v765_v9  ;;  %v336_v22 = vadd.f32 %v335_v63, %v334_v7  ;;  %v293_v26 = vmul.f32 %v779_v13, %v292_v16  ;;  %v338_v27 = vmul.f32 %v774_v12, %v284_v61 }
  0x4c   : > { %621 = vtanh.f32 %v268_v8  ;;  %v289_v24 = vmul.f32 %v771_v11, %v288_v18  ;;  %v339_v29 = vmul.f32 %v782_v15, %v286_v3  ;;  %v343_v31 = vmul.f32 %v782_v15, %v291_v5 }
  0x4d   : > { %623 = vtanh.f32 %v326_v19  ;;  %v364_v33 = vadd.f32 %v363_v47, %v362_v17  ;;  %v366_v34 = vmul.f32 %v802_v30, %v789_v23  ;;  %v367_v36 = vmul.f32 %v813_v35, %v799_v28 }
  0x4e   : > { %v290_v9 = vadd.f32 %v289_v24, %v283_v20  ;;  %v371_v11 = vmul.f32 %v813_v35, %v806_v32  ;;  %v380_v13 = vmul.f32 %v795_v25, %v275_v50  ;;  %v337_v37 = vmul.f32 %v768_v10, %v336_v22 }
  0x4f   : > { %v340_v38 = vadd.f32 %v339_v29, %v338_v27  ;;  %v344_v39 = vmul.f32 %v782_v15, %v343_v31  ;;  %v381_v40 = vmul.f32 %v802_v30, %v277_v53  ;;  %v365_v41 = vmul.f32 %v795_v25, %v364_v33 }
  0x50   : > { %v294_v23 = vadd.f32 %v293_v26, %v290_v9  ;;  %v368_v42 = vadd.f32 %v367_v36, %v366_v34  ;;  %v383_v43 = vmul.f32 %v813_v35, %v280_v58  ;;  %v386_v32 = vmul.f32 %v802_v30, %v284_v61 }
  0x51   : > { %v341_v28 = vmul.f32 %v774_v12, %v340_v38  ;;  %v382_v44 = vadd.f32 %v381_v40, %v380_v13  ;;  %v387_v10 = vmul.f32 %v813_v35, %v286_v3  ;;  %v372_v47 = vmul.f32 %v813_v35, %v371_v11 }
  0x52   : > { %v296_v46 = vadd.f32 %v295_v21, %v294_v23  ;;  %v369_v15 = vmul.f32 %v802_v30, %v368_v42  ;;  %v391_v48 = vmul.f32 %v813_v35, %v291_v5  ;;  %v270_v56 = vstv %s854_s27 }
  0x53   : > { %v342_v49 = vadd.f32 %v341_v28, %v337_v37  ;;  %v384_v50 = vadd.f32 %v383_v43, %v382_v44  ;;  %v388_v51 = vadd.f32 %v387_v10, %v386_v32  ;;  %v272_v61 = vstv %s563_s28 }
  0x54   : > { %625 = vtanh.f32 %v296_v46  ;;  %v370_v52 = vadd.f32 %v369_v15, %v365_v41  ;;  %v392_v55 = vmul.f32 %v813_v35, %v391_v48  ;;  %v298_v3 = vstv %s562_s30 }
  0x55   : > { %v345_v12 = vadd.f32 %v344_v39, %v342_v49  ;;  %v385_v53 = vmul.f32 %v795_v25, %v384_v50  ;;  %v389_v54 = vmul.f32 %v802_v30, %v388_v51  ;;  %v300_v5 = vstv %s564_s3 }
  0x56   : > { %v373_v57 = vadd.f32 %v372_v47, %v370_v52 }
  0x57   : > { %v346_v58 = vadd.f32 %v345_v12, %v295_v21  ;;  %v390_v59 = vadd.f32 %v389_v54, %v385_v53 }
  0x58   : > { %v374_v62 = vadd.f32 %v373_v57, %v823_v45 }
  0x59   : > { %v622_v60 = vpop.eup %621  ;;  %627 = vtanh.f32 %v346_v58  ;;  %v393_v25 = vadd.f32 %v392_v55, %v390_v59 }
  0x5a   : > { %v624_v63 = vpop.eup %623  ;;  %v271_v0 = vmul.f32 %v622_v60, %v270_v56  ;;  %629 = vtanh.f32 %v374_v62 }
  0x5b   : > { %v328_v1 = vmul.f32 %v624_v63, %v270_v56  ;;  %v394_v35 = vadd.f32 %v393_v25, %v295_v21 }
  0x5c   : > { %v273_v30 = vadd.f32 %v272_v61, %v271_v0 }
  0x5d   : > { %v329_v2 = vadd.f32 %v328_v1, %v272_v61  ;;  %631 = vtanh.f32 %v394_v35 }
  0x5e   : > { %274 = vst [vmem:[%s219_s9] sm:$0xff] %v273_v30 }
  0x5f   : > { %571 = vst [vmem:[%s219_s9 + $0x8] sm:$0xff] %v329_v2 }
  0x61   : > { %v626_v4 = vpop.eup %625 }
  0x62   : > { %v299_v6 = vmul.f32 %v626_v4, %v298_v3 }
  0x64   : > { %v301_v7 = vadd.f32 %v300_v5, %v299_v6 }
  0x65   : > { %v448_v22 = vld [vmem:[%s219_s9] sm:$0xff] (%p901_p4) }
  0x66   : > { %v628_v45 = vpop.eup %627  ;;  %567 = vst [vmem:[%s219_s9 + $0x18] sm:$0xff] %v301_v7  ;;  %v450_v24 = vld [vmem:[%s219_s9 + $0x8] sm:$0xff] (%p901_p4)  ;;  %449 = vst [vmem:[%s409_s7] sm:$0xff] (%p901_p4), %v448_v22 }
  0x67   : > { %v630_v8 = vpop.eup %629  ;;  %v348_v14 = vmul.f32 %v628_v45, %v298_v3  ;;  %451 = vst [vmem:[%s409_s7 + $0x8] sm:$0xff] (%p901_p4), %v450_v24 }
  0x68   : > { %v376_v16 = vmul.f32 %v630_v8, %v270_v56 }
  0x69   : > { %v349_v17 = vadd.f32 %v348_v14, %v300_v5 }
  0x6a   : > { %v632_v18 = vpop.eup %631  ;;  %v377_v19 = vadd.f32 %v376_v16, %v272_v61 }
  0x6b   : > { %572 = vst [vmem:[%s219_s9 + $0x20] sm:$0xff] %v349_v17  ;;  %v396_v20 = vmul.f32 %v632_v18, %v298_v3  ;;  %406 = sbr.rel (!%p901_p4) target bundleno = 120 (0x78), region = 74 }
  0x6c   : > { %576 = vst [vmem:[%s219_s9 + $0x10] sm:$0xff] %v377_v19 }
  0x6d   : > { %v397_v21 = vadd.f32 %v396_v20, %v300_v5  ;;  %v454_v27 = vld [vmem:[%s219_s9 + $0x18] sm:$0xff] (%p901_p4) }
  0x6e   : > { %455 = vst [vmem:[%s409_s7 + $0x30] sm:$0xff] (%p901_p4), %v454_v27 }
  0x6f   : > { %577 = vst [vmem:[%s219_s9 + $0x28] sm:$0xff] %v397_v21 }
  0x72   : > { %v456_v29 = vld [vmem:[%s219_s9 + $0x20] sm:$0xff] }
  0x73   : > { %v452_v26 = vld [vmem:[%s219_s9 + $0x10] sm:$0xff]  ;;  %457 = vst [vmem:[%s409_s7 + $0x38] sm:$0xff] %v456_v29 }
  0x74   : > { %453 = vst [vmem:[%s409_s7 + $0x10] sm:$0xff] %v452_v26 }
  0x76   : > { %v458_v31 = vld [vmem:[%s219_s9 + $0x28] sm:$0xff] }
  0x77   : > { %459 = vst [vmem:[%s409_s7 + $0x40] sm:$0xff] %v458_v31 }
  0x78 PF: > { %p10_p5 = scmp.ge.s32.totalorder %s711_s13, 4   ;;  %s902_s9 = smov %s670_s10 }
  0x79   : > { %s903_s10 = smov %s721_s16  ;;  %s904_s11 = smov %s711_s13 }
  0x7a   :  { %12 = sbr.rel (!%p10_p5) target bundleno = 2 (0x2), region = 157 }
  0x7f   :  { %475 = vsyncpa [#allocation3], 1 }
  0x80   :  { %477 = vsyncpa [#allocation3 + $0x1], 1 }

</bundles_post_ra>
